<compile_context>
chip_gen: v7x
topology: tpu7x:2x2x1
jax: 0.10.0
libtpu: 0.0.40
codegen_flags: <defaults>
</compile_context>

<pallas_src>
import functools

import jax
import jax.numpy as jnp
from jax.experimental import pallas as pl
from jax.experimental.pallas import tpu as pltpu


def _round_up(x, m):
    return (x + m - 1) // m * m


def _vmem_capacity_bytes():
    try:
        return int(pltpu.get_tpu_info().vmem_capacity_bytes)
    except Exception:
        return 64 << 20  # conservative (v7x-sized) fallback


def _focal_loss_kernel(logits_ref, targets_ref, *rest, gamma, n_valid, tile_n,
                       tiles_per_split, has_alpha, dense):
    if has_alpha:
        alpha_ref, out_ref, acc_ref = rest
    else:
        alpha_ref = None
        out_ref, acc_ref = rest

    split = pl.program_id(0)   # parallel (megacore) axis
    step = pl.program_id(1)    # reduction axis over batch tiles

    @pl.when(step == 0)
    def _():
        acc_ref[...] = jnp.zeros_like(acc_ref)

    row0 = (split * tiles_per_split + step) * tile_n

    # Skip all compute for fully-padded grid points (the DMA still runs, the
    # exp/reduce work does not).
    @pl.when(row0 < n_valid)
    def _():
        x = logits_ref[...].astype(jnp.float32)       # (T, C) cast in-kernel
        t = targets_ref[...]                          # (T, 1) int32
        tn, nc = x.shape

        # Numerically stable softmax pieces (lane reduces go to the XLU slot).
        m = jnp.max(x, axis=-1, keepdims=True)                        # (T, 1)
        s = jnp.sum(jnp.exp(x - m), axis=-1, keepdims=True)           # (T, 1)

        # Gather the target logit (and alpha weight) with a single select +
        # lane reduce each; avoids the full-tile (lse - x) subtraction and the
        # onehot-cast multiply of the previous version.
        class_ids = jax.lax.broadcasted_iota(jnp.int32, (tn, nc), 1)
        hit = class_ids == t                                          # (T, C)
        x_y = jnp.sum(jnp.where(hit, x, 0.0), axis=-1, keepdims=True)  # (T, 1)

        lse = m + jnp.log(s)                                          # (T, 1)
        ce = lse - x_y                                                # (T, 1)
        if has_alpha:
            a = alpha_ref[...].astype(jnp.float32)                    # (1, C)
            a_y = jnp.sum(jnp.where(hit, a, 0.0), axis=-1, keepdims=True)
            ce = a_y * ce

        # Repack the per-row column into a lane-dense tile so the pointwise
        # epilogue + accumulator touch 128x fewer vregs (column fallback for
        # tiny tiles).
        if dense:
            rows = tile_n // 128
            ce = ce.reshape(rows, 128)
            row_ids = row0 + (
                jax.lax.broadcasted_iota(jnp.int32, (rows, 128), 0) * 128
                + jax.lax.broadcasted_iota(jnp.int32, (rows, 128), 1))
        else:
            row_ids = row0 + jax.lax.broadcasted_iota(jnp.int32, (tile_n, 1), 0)

        pt = jnp.exp(-ce)
        d = jnp.maximum(1.0 - pt, 0.0)   # clamp: rounding can make pt slightly > 1
        g = float(gamma)
        if g == 2.0:                                   # module default: 2 VPU muls
            focal = d * d * ce
        elif g == float(int(g)) and 0 <= int(g) <= 8:  # small integer gamma
            w = jnp.ones_like(d)
            for _ in range(int(g)):
                w = w * d
            focal = w * ce
        else:                                          # general float gamma
            focal = (d ** jnp.float32(g)) * ce

        # Mask rows past the true batch size with a TRUE SELECT (0 * NaN from
        # garbage padded rows would otherwise poison the sum).
        focal = jnp.where(row_ids < n_valid, focal, 0.0)

        # Cheap lane-dense VPU add; the full reduce is deferred to the last step.
        acc_ref[...] += focal

    @pl.when(step == tiles_per_split - 1)
    def _():
        total = jnp.sum(acc_ref[...])
        out_ref[...] = jnp.full(out_ref.shape, total, jnp.float32)


def focal_loss(logits, targets, alpha=None, gamma=2.0, tile_n=None):
    """Pallas FocalLoss forward. logits: (N, C) float (any dtype), targets: (N,) int."""
    n, c = logits.shape
    has_alpha = alpha is not None
    targets_2d = targets.astype(jnp.int32).reshape(n, 1)
    itemsize = jnp.dtype(logits.dtype).itemsize

    # Generation-aware VMEM budgets: v5e/v6e have 128 MiB physical VMEM,
    # v7x only 64 MiB.
    vmem_cap = _vmem_capacity_bytes()
    if vmem_cap >= (100 << 20):         # v5e / v6e
        logits_budget = 24 << 20
        vmem_limit = 64 << 20
    else:                               # v7x or unknown
        logits_budget = 12 << 20
        vmem_limit = 48 << 20

    # Tile sizing: biggest batch tile whose double-buffered logits block fits
    # the budget (this kernel is HBM-bandwidth-bound; 2-8+ MiB blocks get
    # ~85% of HBM roofline vs ~30-60% at sub-512-row tiles).
    if tile_n is None:
        tile_n = logits_budget // (2 * c * itemsize)
    tile_n = max(8, min(int(tile_n), 16384, _round_up(n, 8)))
    if tile_n >= 128:
        tile_n = (tile_n // 128) * 128   # lane-dense epilogue needs % 128 == 0
    else:
        tile_n = _round_up(tile_n, 8)
    dense = (tile_n % 128 == 0)

    n_tiles = pl.cdiv(n, tile_n)
    num_splits = 2 if n_tiles >= 2 else 1          # shard batch over v7x's 2 TCs
    tiles_per_split = pl.cdiv(n_tiles, num_splits)
    grid = (num_splits, tiles_per_split)

    def n_block(split, step):
        blk = split * tiles_per_split + step
        # Clamp so padded grid points never request an out-of-range block
        # (their rows are masked / compute skipped inside the kernel anyway).
        return (jnp.minimum(blk, n_tiles - 1), 0)

    in_specs = [
        pl.BlockSpec((tile_n, c), n_block),                 # logits (HBM dtype)
        pl.BlockSpec((tile_n, 1), n_block),                 # targets
    ]
    inputs = [logits, targets_2d]
    if has_alpha:
        in_specs.append(pl.BlockSpec((1, c), lambda split, step: (0, 0)))  # resident
        inputs.append(jnp.asarray(alpha, jnp.float32).reshape(1, c))

    acc_shape = (tile_n // 128, 128) if dense else (tile_n, 1)

    kernel = functools.partial(
        _focal_loss_kernel,
        gamma=float(gamma), n_valid=n, tile_n=tile_n,
        tiles_per_split=tiles_per_split, has_alpha=has_alpha, dense=dense)

    cost = pl.CostEstimate(
        flops=8 * n * c + 16 * n,
        transcendentals=n * c + 3 * n,
        bytes_accessed=n * c * itemsize + n * 4 + (c * 4 if has_alpha else 0)
                       + num_splits * 8 * 128 * 4,
    )

    out = pl.pallas_call(
        kernel,
        out_shape=jax.ShapeDtypeStruct((num_splits, 8, 128), jnp.float32),
        grid=grid,
        in_specs=in_specs,
        out_specs=pl.BlockSpec((1, 8, 128), lambda split, step: (split, 0, 0)),
        scratch_shapes=[pltpu.VMEM(acc_shape, jnp.float32)],
        compiler_params=pltpu.CompilerParams(
            dimension_semantics=("parallel", "arbitrary"),
            vmem_limit_bytes=vmem_limit,
        ),
        cost_estimate=cost,
    )(*inputs)

    # Tiny wrapper-side reduction of the per-split partial sums; divide by true N.
    partials = out[:, 0, 0]
    return jnp.sum(partials) / jnp.float32(n)


def _focal_loss_ref(logits, targets, alpha, gamma):
    """Pure-JAX reference matching torch semantics, for verification."""
    logp = jax.nn.log_softmax(logits.astype(jnp.float32), axis=-1)
    logp_y = jnp.take_along_axis(logp, targets[:, None].astype(jnp.int32), axis=-1)[:, 0]
    w_y = alpha[targets]
    ce = -w_y * logp_y
    pt = jnp.exp(-ce)
    return jnp.mean((1.0 - pt) ** gamma * ce)


if __name__ == "__main__":
    key = jax.random.PRNGKey(0)
    k1, k2, k3, k4, k5, k6, k7 = jax.random.split(key, 7)

    # Case 1: tiny shape implied by the training script (single tile, C=16),
    # alpha supplied, small-tile column epilogue path.
    N1, C1 = 8, 16
    logits1 = jax.random.normal(k1, (N1, C1), dtype=jnp.float32)
    targets1 = jax.random.randint(k2, (N1,), 0, C1, dtype=jnp.int32)
    alpha1 = jax.random.uniform(k3, (C1,), dtype=jnp.float32, minval=0.5, maxval=1.5)
    loss1 = jax.block_until_ready(focal_loss(logits1, targets1, alpha=alpha1, gamma=2.0))
    ref1 = _focal_loss_ref(logits1, targets1, alpha1, 2.0)
    assert jnp.allclose(loss1, ref1, rtol=1e-5, atol=1e-6), (loss1, ref1)

    # Case 2: bf16 logits kept in HBM (cast in-kernel), N not a multiple of the
    # tile -> multi-tile grid, 2-way megacore split, masked partial/padded
    # tiles, no alpha (alpha input/multiply skipped), lane-dense epilogue.
    N2, C2 = 300, 128
    logits2 = jax.random.normal(k4, (N2, C2), dtype=jnp.float32).astype(jnp.bfloat16)
    targets2 = jax.random.randint(k5, (N2,), 0, C2, dtype=jnp.int32)
    loss2 = jax.block_until_ready(focal_loss(logits2, targets2, gamma=2.0, tile_n=128))
    ref2 = _focal_loss_ref(logits2.astype(jnp.float32), targets2,
                           jnp.ones((C2,), jnp.float32), 2.0)
    assert jnp.allclose(loss2, ref2, rtol=1e-4, atol=1e-5), (loss2, ref2)

    # Case 3: automatic (generation-aware) tile sizing -> single large tile,
    # alpha supplied, lane-dense epilogue, non-128 class count.
    N3, C3 = 1536, 64
    logits3 = jax.random.normal(k6, (N3, C3), dtype=jnp.float32)
    targets3 = jax.random.randint(k7, (N3,), 0, C3, dtype=jnp.int32)
    alpha3 = jnp.linspace(0.5, 1.5, C3, dtype=jnp.float32)
    loss3 = jax.block_until_ready(focal_loss(logits3, targets3, alpha=alpha3, gamma=2.0))
    ref3 = _focal_loss_ref(logits3, targets3, alpha3, 2.0)
    assert jnp.allclose(loss3, ref3, rtol=1e-5, atol=1e-6), (loss3, ref3)

    print("KERNEL_OK")
</pallas_src>

<mosaic_0001>
module attributes {stable_mosaic.version = 11 : i64} {
  func.func @_focal_loss_kernel(%arg0: i32, %arg1: i32, %arg2: memref<8x16xf32, #tpu.memory_space<vmem>>, %arg3: memref<8x1xi32, #tpu.memory_space<vmem>>, %arg4: memref<1x16xf32, #tpu.memory_space<vmem>>, %arg5: memref<1x8x128xf32, #tpu.memory_space<vmem>>, %arg6: memref<8x1xf32, #tpu.memory_space<vmem>>) attributes {dimension_semantics = [#tpu.dimension_semantics<parallel>, #tpu.dimension_semantics<arbitrary>], iteration_bounds = array<i64: 1, 1>, scalar_prefetch = 0 : i64, scratch_operands = 1 : i64, tpu.core_type = #tpu.core_type<tc>, window_params = [{transform_indices = @transform_0, window_bounds = array<i64: 8, 16>}, {transform_indices = @transform_1, window_bounds = array<i64: 8, 1>}, {pipeline_mode = #tpu.pipeline_mode<synchronous>, transform_indices = @transform_2, window_bounds = array<i64: 1, 16>}, {transform_indices = @transform_3, window_bounds = array<i64: 1, 8, 128>}]} {
    %c0_i32 = arith.constant 0 : i32
    %0 = arith.cmpi eq, %arg1, %c0_i32 : i32
    %1 = arith.extui %0 : i1 to i32
    %c0_i32_0 = arith.constant 0 : i32
    %2 = arith.cmpi ne, %1, %c0_i32_0 : i32
    scf.if %2 {
      %cst = arith.constant 0.000000e+00 : f32
      %12 = vector.broadcast %cst : f32 to vector<8x1xf32>
      %c0 = arith.constant 0 : index
      %c0_5 = arith.constant 0 : index
      %13 = vector.load %arg6[%c0, %c0_5] : memref<8x1xf32, #tpu.memory_space<vmem>>, vector<8x1xf32>
      tpu.vector_store %arg6[%c0, %c0_5], %12 {strides = array<i32>} : memref<8x1xf32, #tpu.memory_space<vmem>>, vector<8x1xf32>,
    } else {
    }
    %c1_i32 = arith.constant 1 : i32
    %3 = arith.muli %arg0, %c1_i32 : i32
    %4 = arith.addi %3, %arg1 : i32
    %c8_i32 = arith.constant 8 : i32
    %5 = arith.muli %4, %c8_i32 : i32
    %c8_i32_1 = arith.constant 8 : i32
    %6 = arith.cmpi slt, %5, %c8_i32_1 : i32
    %7 = arith.extui %6 : i1 to i32
    %c0_i32_2 = arith.constant 0 : i32
    %8 = arith.cmpi ne, %7, %c0_i32_2 : i32
    scf.if %8 {
      %c0 = arith.constant 0 : index
      %c0_5 = arith.constant 0 : index
      %12 = vector.load %arg2[%c0, %c0_5] : memref<8x16xf32, #tpu.memory_space<vmem>>, vector<8x16xf32>
      %c0_6 = arith.constant 0 : index
      %c0_7 = arith.constant 0 : index
      %13 = vector.load %arg3[%c0_6, %c0_7] : memref<8x1xi32, #tpu.memory_space<vmem>>, vector<8x1xi32>
      %cst = arith.constant dense<0xFF800000> : vector<8xf32>
      %14 = vector.multi_reduction <maximumf>, %12, %cst [1] : vector<8x16xf32> to vector<8xf32>
      %15 = vector.shape_cast %14 : vector<8xf32> to vector<8x1xf32>
      %16 = vector.broadcast %15 : vector<8x1xf32> to vector<8x16xf32>
      %17 = arith.subf %12, %16 : vector<8x16xf32>
      %18 = math.exp %17 : vector<8x16xf32>
      %cst_8 = arith.constant dense<0.000000e+00> : vector<8xf32>
      %19 = vector.multi_reduction <add>, %18, %cst_8 [1] : vector<8x16xf32> to vector<8xf32>
      %20 = vector.shape_cast %19 : vector<8xf32> to vector<8x1xf32>
      %21 = tpu.iota {dimensions = array<i32: 1>} : vector<8x16xi32>
      %22 = vector.broadcast %13 : vector<8x1xi32> to vector<8x16xi32>
      %23 = arith.cmpi eq, %21, %22 : vector<8x16xi32>
      %cst_9 = arith.constant 0.000000e+00 : f32
      %24 = vector.broadcast %cst_9 : f32 to vector<8x16xf32>
      %25 = arith.select %23, %12, %24 : vector<8x16xi1>, vector<8x16xf32>
      %cst_10 = arith.constant dense<0.000000e+00> : vector<8xf32>
      %26 = vector.multi_reduction <add>, %25, %cst_10 [1] : vector<8x16xf32> to vector<8xf32>
      %27 = vector.shape_cast %26 : vector<8xf32> to vector<8x1xf32>
      %28 = math.log %20 : vector<8x1xf32>
      %29 = arith.addf %15, %28 : vector<8x1xf32>
      %30 = arith.subf %29, %27 : vector<8x1xf32>
      %c0_11 = arith.constant 0 : index
      %c0_12 = arith.constant 0 : index
      %31 = vector.load %arg4[%c0_11, %c0_12] : memref<1x16xf32, #tpu.memory_space<vmem>>, vector<1x16xf32>
      %cst_13 = arith.constant 0.000000e+00 : f32
      %32 = vector.shape_cast %31 : vector<1x16xf32> to vector<1x16xf32>
      %33 = vector.broadcast %32 : vector<1x16xf32> to vector<8x16xf32>
      %34 = vector.broadcast %cst_13 : f32 to vector<8x16xf32>
      %35 = arith.select %23, %33, %34 : vector<8x16xi1>, vector<8x16xf32>
      %cst_14 = arith.constant dense<0.000000e+00> : vector<8xf32>
      %36 = vector.multi_reduction <add>, %35, %cst_14 [1] : vector<8x16xf32> to vector<8xf32>
      %37 = vector.shape_cast %36 : vector<8xf32> to vector<8x1xf32>
      %38 = arith.mulf %37, %30 : vector<8x1xf32>
      %39 = tpu.iota {dimensions = array<i32: 0>} : vector<8x1xi32>
      %40 = vector.broadcast %5 : i32 to vector<8x1xi32>
      %41 = arith.addi %40, %39 : vector<8x1xi32>
      %cst_15 = arith.constant 0.000000e+00 : f32
      %42 = vector.broadcast %cst_15 : f32 to vector<8x1xf32>
      %43 = arith.subf %42, %38 : vector<8x1xf32>
      %44 = math.exp %43 : vector<8x1xf32>
      %cst_16 = arith.constant 1.000000e+00 : f32
      %45 = vector.broadcast %cst_16 : f32 to vector<8x1xf32>
      %46 = arith.subf %45, %44 : vector<8x1xf32>
      %cst_17 = arith.constant 0.000000e+00 : f32
      %47 = vector.broadcast %cst_17 : f32 to vector<8x1xf32>
      %48 = arith.maximumf %46, %47 : vector<8x1xf32>
      %49 = arith.mulf %48, %48 : vector<8x1xf32>
      %50 = arith.mulf %49, %38 : vector<8x1xf32>
      %c8_i32_18 = arith.constant 8 : i32
      %51 = vector.broadcast %c8_i32_18 : i32 to vector<8x1xi32>
      %52 = arith.cmpi slt, %41, %51 : vector<8x1xi32>
      %cst_19 = arith.constant 0.000000e+00 : f32
      %53 = vector.broadcast %cst_19 : f32 to vector<8x1xf32>
      %54 = arith.select %52, %50, %53 : vector<8x1xi1>, vector<8x1xf32>
      %c0_20 = arith.constant 0 : index
      %c0_21 = arith.constant 0 : index
      %55 = vector.load %arg6[%c0_20, %c0_21] : memref<8x1xf32, #tpu.memory_space<vmem>>, vector<8x1xf32>
      %56 = arith.addf %55, %54 : vector<8x1xf32>
      %c0_22 = arith.constant 0 : index
      %c0_23 = arith.constant 0 : index
      %57 = vector.load %arg6[%c0_22, %c0_23] : memref<8x1xf32, #tpu.memory_space<vmem>>, vector<8x1xf32>
      tpu.vector_store %arg6[%c0_22, %c0_23], %56 {strides = array<i32>} : memref<8x1xf32, #tpu.memory_space<vmem>>, vector<8x1xf32>,
    } else {
    }
    %c0_i32_3 = arith.constant 0 : i32
    %9 = arith.cmpi eq, %arg1, %c0_i32_3 : i32
    %10 = arith.extui %9 : i1 to i32
    %c0_i32_4 = arith.constant 0 : i32
    %11 = arith.cmpi ne, %10, %c0_i32_4 : i32
    scf.if %11 {
      %c0 = arith.constant 0 : index
      %c0_5 = arith.constant 0 : index
      %12 = vector.load %arg6[%c0, %c0_5] : memref<8x1xf32, #tpu.memory_space<vmem>>, vector<8x1xf32>
      %13 = vector.shape_cast %12 : vector<8x1xf32> to vector<1x8x1xf32>
      %cst = arith.constant dense<0.000000e+00> : vector<1xf32>
      %14 = vector.multi_reduction <add>, %13, %cst [1, 2] : vector<1x8x1xf32> to vector<1xf32>
      %15 = vector.shape_cast %14 : vector<1xf32> to vector<1x1x1xf32>
      %16 = vector.extract %15[0, 0, 0] : f32 from vector<1x1x1xf32>
      %17 = vector.broadcast %16 : f32 to vector<1x8x128xf32>
      %c0_6 = arith.constant 0 : index
      %c0_7 = arith.constant 0 : index
      %c0_8 = arith.constant 0 : index
      %18 = vector.load %arg5[%c0_6, %c0_7, %c0_8] : memref<1x8x128xf32, #tpu.memory_space<vmem>>, vector<1x8x128xf32>
      tpu.vector_store %arg5[%c0_6, %c0_7, %c0_8], %17 {strides = array<i32>} : memref<1x8x128xf32, #tpu.memory_space<vmem>>, vector<1x8x128xf32>,
    } else {
    }
    return
  }
  func.func @transform_0(%arg0: i32, %arg1: i32) -> (i32, i32) {
    %c1_i32 = arith.constant 1 : i32
    %0 = arith.muli %arg0, %c1_i32 : i32
    %1 = arith.addi %0, %arg1 : i32
    %c0_i32 = arith.constant 0 : i32
    %2 = arith.minsi %1, %c0_i32 : i32
    %c0_i32_0 = arith.constant 0 : i32
    %c0_i32_1 = arith.constant 0 : i32
    return %2, %c0_i32_0 : i32, i32
  }
  func.func @transform_1(%arg0: i32, %arg1: i32) -> (i32, i32) {
    %c1_i32 = arith.constant 1 : i32
    %0 = arith.muli %arg0, %c1_i32 : i32
    %1 = arith.addi %0, %arg1 : i32
    %c0_i32 = arith.constant 0 : i32
    %2 = arith.minsi %1, %c0_i32 : i32
    %c0_i32_0 = arith.constant 0 : i32
    %c0_i32_1 = arith.constant 0 : i32
    return %2, %c0_i32_0 : i32, i32
  }
  func.func @transform_2(%arg0: i32, %arg1: i32) -> (i32, i32) {
    %c0_i32 = arith.constant 0 : i32
    %c0_i32_0 = arith.constant 0 : i32
    %c0_i32_1 = arith.constant 0 : i32
    return %c0_i32, %c0_i32_0 : i32, i32
  }
  func.func @transform_3(%arg0: i32, %arg1: i32) -> (i32, i32, i32) {
    %c0_i32 = arith.constant 0 : i32
    %c0_i32_0 = arith.constant 0 : i32
    %c0_i32_1 = arith.constant 0 : i32
    return %arg0, %c0_i32, %c0_i32_0 : i32, i32, i32
  }
}

</mosaic_0001>

<bundles_post_ra>
// kernel: tpu_custom_call.1
= control target key start
LH: loop header
LB: loop body
LE: loop exit
PB: predicated region body
PF: predicated region fallthrough
CT: control target
= control target key end

     0   :  { %vm83_vm0 = vcmask 130048   ;;  %s267_s0 = inlined_call_operand.vmem [shape: f32[8,16], index: 0, kind: input, shape index: {}]   ;;  %s268_s1 = inlined_call_operand.vmem [shape: s32[8,1], index: 1, kind: input, shape index: {}]   ;;  %s269_s2 = inlined_call_operand.vmem [shape: f32[1,16], index: 2, kind: input, shape index: {}]   ;;  %s270_s3 = inlined_call_operand.hbm [shape: f32[1,8,128], index: 3, kind: output, shape index: {}]  }
   0x1   :  { %v81_v0 = vld [vmem:[%s267_s0] sm:$0xff] }
   0x2   :  { %8 = vsyncpa [#allocation4], 0  ;;  %v84_v1 = vsel %vm83_vm0, %v81_v0, -inf  ;;  %v216_v2 = vmov 0   ;;  %v82_v3 = vld [vmem:[%s268_s1] sm:$0xff]  ;;  %v93_v7 = vlaneseq  ;;  %vm73_vm2 = vcmask 7168  }
   0x3   :  { %185 = vset.pattern.permute.xlu0 %v216_v2  ;;  %v179_v13 = vld [vmem:[%s269_s2] ss:$0 sm:$0xff]  ;;  %v217_v17 = vmov 0.0   ;;  %s218_s1 = smov [#allocation3]  }
   0x4   :  { %85 = vmax.xlane.f32.xlu0 %v84_v1  ;;  %v94_v8 = vand.u32 127, %v93_v7  ;;  %74 = vst.msk [vmem:[#allocation2] sm:$0xff] %vm73_vm2, %v217_v17  ;;  %s159_s2 = sshll.u32 %s218_s1, 4  ;;  %s160_s2 = int_to_ptr.vmem [resolvable:$true] %s159_s2 }
   0x5   :  { %s192_s18 = scalar_lea.vmem %s160_s2, 128  ;;  %p197_p1 = scmp.lt.s32.totalorder %s160_s2, %s160_s2 }
   0x6   :  { %p193_p0 = scmp.ne.s32.totalorder %s160_s2, %s192_s18  ;;  %p198_p2 = scmp.lt.s32.totalorder %s192_s18, %s192_s18 }
   0x8   :  { %p199_p3 = por %p198_p2, %p197_p1 }
   0xa   :  { %p200_p4 = pnand %p199_p3, %p193_p0 }
   0xb   :  { %v132_v32 = vld [vmem:[#allocation2] sm:$0xff] }
  0x1a   :  { %96 = vperm.xlu0 %185, %v82_v3  }
  0x91   :  { %v86_v4 = vpop.xlane.xlu0 %85 }
  0x92   :  { %v87_v5 = vsub.f32 %v81_v0, %v86_v4 }
  0x94   :  { %v88_v6 = vmul.f32 1.442695, %v87_v5 }
  0x96   :  { %186 = vpow2.f32 %v88_v6 }
  0x99   :  { %v97_v9 = vpop.permute.xlu0 %96 }
  0x9a   :  { %vm98_vm1 = vcmp.eq.s32.totalorder %v94_v8, %v97_v9 }
  0x9b   :  { %v99_v11 = vsel %vm98_vm1, %v81_v0, 0.0  ;;  %v114_v15 = vsel %vm98_vm1, %v179_v13, 0.0 }
  0x9c   :  { %v100_v14 = vsel %vm83_vm0, %v99_v11, 0.0  ;;  %v115_v16 = vsel %vm83_vm0, %v114_v15, 0.0 }
  0xa0   :  { %v187_v10 = vpop.eup %186 }
  0xa1   :  { %v90_v12 = vsel %vm83_vm0, %v187_v10, 0.0 }
  0xa2   :  { %91 = vadd.xlane.f32.xlu1 %v90_v12 }
  0xa6   :  { %101 = vadd.xlane.f32.xlu1 %v100_v14 }
  0xaa   :  { %116 = vadd.xlane.f32.xlu1 %v115_v16 }
 0x12f   :  { %v92_v18 = vpop.xlane.xlu1 %91 }
 0x130   :  { %188 = vlog2.f32 %v92_v18 }
 0x133   :  { %v102_v20 = vpop.xlane.xlu1 %101 }
 0x137   :  { %v117_v24 = vpop.xlane.xlu1 %116 }
 0x13a   :  { %v189_v19 = vpop.eup %188 }
 0x13b   :  { %v104_v21 = vmul.f32 0.6931472, %v189_v19 }
 0x13d   :  { %v105_v22 = vadd.f32 %v104_v21, %v86_v4 }
 0x13f   :  { %v106_v23 = vsub.f32 %v105_v22, %v102_v20 }
 0x141   :  { %v118_v25 = vmul.f32 %v117_v24, %v106_v23 }
 0x143   :  { %v123_v26 = vsub.f32 0.0, %v118_v25 }
 0x145   :  { %v124_v27 = vmul.f32 1.442695, %v123_v26 }
 0x147   :  { %190 = vpow2.f32 %v124_v27 }
 0x151   :  { %v191_v28 = vpop.eup %190 }
 0x152   :  { %v126_v29 = vsub.f32 1.0, %v191_v28 }
 0x154   :  { %v127_v30 = vmax.f32 %v126_v29, 0.0 }
 0x156   :  { %v128_v31 = vmul.f32 %v127_v30, %v127_v30 }
 0x158   :  { %v129_v33 = vmul.f32 %v128_v31, %v118_v25 }
 0x15a   :  { %v133_v34 = vadd.f32 %v132_v32, %v129_v33 }
 0x15c   :  { %135 = vst.msk [vmem:[#allocation2] sm:$0xff] %vm73_vm2, %v133_v34 }
 0x163   :  { %v139_v35 = vld [vmem:[#allocation2] sm:$0xff] }
 0x164   :  { %v141_v36 = vsel %vm73_vm2, %v139_v35, 0.0 }
 0x165   :  { %142 = vadd.xlane.f32.xlu1 %v141_v36 }
 0x1f2   :  { %v143_v37 = vpop.xlane.xlu1 %142 }
 0x1f3   :  { %v144_v38 = vrot.slane %v143_v37, 4 }
 0x1f5   :  { %v145_v39 = vadd.f32 %v144_v38, %v143_v37 }
 0x1f7   :  { %v146_v40 = vrot.slane %v145_v39, 2 }
 0x1f9   :  { %v147_v41 = vadd.f32 %v146_v40, %v145_v39 }
 0x1fb   :  { %v148_v42 = vrot.slane %v147_v41, 1 }
 0x1fd   :  { %v149_v43 = vadd.f32 %v148_v42, %v147_v41 }
 0x1ff   :  { %180 = vpush %v149_v43 }
 0x230   :  { %s181_s17 = spop %180 }
 0x231   :  { %v151_v44 = vstv %s181_s17 }
 0x232   :  { %152 = vst [vmem:[#allocation3] sm:$0xff] %v151_v44 }
 0x233   :  { %203 = shalt.err (!%p200_p4)
}
 0x234   :  { %s204_s21 = scalar_lea.hbm %s270_s3, 128 }
 0x235   :  { %p205_p5 = scmp.ne.s32.totalorder %s270_s3, %s204_s21  ;;  %p208_p6 = scmp.lt.u32.totalorder %s204_s21, %s270_s3 }
 0x237   :  { %p210_p7 = pnand %p208_p6, %p205_p5 }
 0x239   :  { %213 = shalt.err (!%p210_p7)
}
 0x23a   :  { %162 = dma.vmem_to_hbm [thread:$0]  %s160_s2, 128, %s270_s3, [#allocation4]  }
 0x23b   :  { %214 = dma.done.wait [#allocation4], 128  }
 0x23c   :  { %215 = vsyncadd [#allocation4], 4294967168 }
 0x23d   :  { %166 = vsyncpa [#allocation4], 1 }

</bundles_post_ra>
